<compile_context>
chip_gen: v5e
topology: v5e:2x2
jax: 0.10.0
libtpu: 0.0.40
codegen_flags: <defaults>
</compile_context>

<pallas_src>
import jax
import jax.numpy as jnp
from jax import lax
from jax.experimental import pallas as pl
from jax.experimental.pallas import tpu as pltpu


def _round_up(x, m):
    return ((x + m - 1) // m) * m


def mlp_kernel(x_ref, w1t_ref, b1_ref, w2t_ref, b2_ref, w3_ref, b3_ref, o_ref):
    """Fused 3-layer MLP, batch-on-lanes: outᵀ = f3(f2(f1(xᵀ)))."""
    x = x_ref[...]                                            # (TB, D), batch on sublanes

    # Layer 1: contract W1ᵀ (H1, D) with x (TB, D) on the shared D axis
    # (NT matmul) -> (H1, TB).  No explicit transpose of the big x tile.
    h1 = lax.dot_general(
        w1t_ref[...], x,
        dimension_numbers=(((1,), (1,)), ((), ())),
        preferred_element_type=jnp.float32,
    )
    h1 = jnp.maximum(h1 + b1_ref[...], 0.0)                   # (H1, TB), lane-dense ReLU

    # Layer 2: (H2, H1) @ (H1, TB) -> (H2, TB)
    h2 = jnp.dot(w2t_ref[...], h1, preferred_element_type=jnp.float32)
    h2 = jnp.maximum(h2 + b2_ref[...], 0.0)                   # (H2, TB)

    # Layer 3 (single output unit): weighted sublane reduce instead of an
    # M=1 matmul -> lane-dense (1, TB) row.
    out = jnp.sum(h2 * w3_ref[...], axis=0, keepdims=True)    # (1, TB)
    o_ref[...] = (out + b3_ref[...]).astype(o_ref.dtype)


def simple_baseline_forward(x, params, *, batch_tile=8192):
    """Pallas implementation of SimpleBaseline.forward.

    x: (B, D) float32 (or a single state of shape (D,)).
    Returns (B,) float32 — the .squeeze(-1) of the module (scalar for a single state).
    """
    w1, b1, w2, b2, w3, b3 = params

    single = (x.ndim == 1)
    if single:
        x = x[None, :]

    B, D = x.shape
    H1 = w1.shape[1]   # 32
    H2 = w2.shape[1]   # 16
    H3 = w3.shape[1]   # 1 (final layer of the module)

    # Lane-multiple batch tile, capped by the requested tile size; pad the
    # batch so the grid divides evenly (padded rows are computed and dropped).
    TB = min(_round_up(batch_tile, 128), _round_up(B, 128))
    grid = pl.cdiv(B, TB)
    B_pad = grid * TB
    if B_pad != B:
        x = jnp.pad(x, ((0, B_pad - B), (0, 0)))

    # Tiny weight transposes / bias reshapes done once in the wrapper (free).
    w1t = w1.T                      # (H1, D)
    w2t = w2.T                      # (H2, H1)
    b1c = b1.reshape(H1, 1)
    b2c = b2.reshape(H2, 1)
    b3c = b3.reshape(H3, 1)         # (1, 1)
    # w3 stays as an (H2, 1) column — broadcast weight for the sublane reduce.

    out = pl.pallas_call(
        mlp_kernel,
        out_shape=jax.ShapeDtypeStruct((H3, B_pad), jnp.float32),
        grid_spec=pltpu.PrefetchScalarGridSpec(
            num_scalar_prefetch=0,
            grid=(grid,),
            in_specs=[
                pl.BlockSpec((TB, D), lambda i: (i, 0)),      # x batch tile
                pl.BlockSpec((H1, D), lambda i: (0, 0)),      # W1ᵀ (whole, constant)
                pl.BlockSpec((H1, 1), lambda i: (0, 0)),      # b1 column
                pl.BlockSpec((H2, H1), lambda i: (0, 0)),     # W2ᵀ
                pl.BlockSpec((H2, 1), lambda i: (0, 0)),      # b2 column
                pl.BlockSpec((H2, H3), lambda i: (0, 0)),     # w3 column (16, 1)
                pl.BlockSpec((H3, 1), lambda i: (0, 0)),      # b3
            ],
            out_specs=pl.BlockSpec((H3, TB), lambda i: (0, i)),  # lane-dense (1, TB) row
        ),
        compiler_params=pltpu.CompilerParams(
            dimension_semantics=("parallel",),
            vmem_limit_bytes=48 * 1024 * 1024,
        ),
    )(x, w1t, b1c, w2t, b2c, w3, b3c)

    result = out[0, :B]             # drop padding, squeeze(-1)
    return result[0] if single else result


def init_params(key, state_dim):
    """Deterministic init matching nn.Linear (U(-1/sqrt(fan_in), 1/sqrt(fan_in)))."""
    dims = [(state_dim, 32), (32, 16), (16, 1)]
    params = []
    for (fan_in, fan_out) in dims:
        key, kw, kb = jax.random.split(key, 3)
        bound = 1.0 / jnp.sqrt(jnp.float32(fan_in))
        # stored as (in, out) == nn.Linear weight (out, in) transposed
        w = jax.random.uniform(kw, (fan_in, fan_out), jnp.float32, -bound, bound)
        b = jax.random.uniform(kb, (fan_out,), jnp.float32, -bound, bound)
        params.extend([w, b])
    return tuple(params)


def reference_forward(x, params):
    w1, b1, w2, b2, w3, b3 = params
    h1 = jnp.maximum(x @ w1 + b1, 0.0)
    h2 = jnp.maximum(h1 @ w2 + b2, 0.0)
    return (h2 @ w3 + b3)[:, 0]


if __name__ == "__main__":
    key = jax.random.PRNGKey(0)
    key, kx = jax.random.split(key)

    batch, state_dim = 8, 32
    x = jax.random.normal(kx, (batch, state_dim), dtype=jnp.float32)
    params = init_params(key, state_dim)

    out = jax.block_until_ready(simple_baseline_forward(x, params))
    ref = reference_forward(x, params)
    assert out.shape == (batch,), out.shape
    assert jnp.allclose(out, ref, atol=1e-5, rtol=1e-5), (out, ref)

    # Non-divisible batch + forced small tile exercises the cdiv/pad path and a
    # multi-step "parallel" grid (megacore sharding on v7x).
    key, kx2 = jax.random.split(key)
    batch2 = 300
    x2 = jax.random.normal(kx2, (batch2, state_dim), dtype=jnp.float32)
    out2 = jax.block_until_ready(simple_baseline_forward(x2, params, batch_tile=128))
    ref2 = reference_forward(x2, params)
    assert out2.shape == (batch2,), out2.shape
    assert jnp.allclose(out2, ref2, atol=1e-5, rtol=1e-5)

    # Single-state path (module's forward on one state, as used by get_value).
    key, kx3 = jax.random.split(key)
    x3 = jax.random.normal(kx3, (state_dim,), dtype=jnp.float32)
    out3 = jax.block_until_ready(simple_baseline_forward(x3, params))
    ref3 = reference_forward(x3[None, :], params)[0]
    assert out3.shape == (), out3.shape
    assert jnp.allclose(out3, ref3, atol=1e-5, rtol=1e-5)

    # TODO(synk): optimizer (Adam), MSELoss, update()/get_value() are training
    # utilities outside the forward pass and are not implemented here.
    print("KERNEL_OK")
</pallas_src>

<mosaic_0001>
module attributes {stable_mosaic.version = 11 : i64} {
  func.func @mlp_kernel(%arg0: i32, %arg1: memref<128x32xf32, #tpu.memory_space<vmem>>, %arg2: memref<32x32xf32, #tpu.memory_space<vmem>>, %arg3: memref<32x1xf32, #tpu.memory_space<vmem>>, %arg4: memref<16x32xf32, #tpu.memory_space<vmem>>, %arg5: memref<16x1xf32, #tpu.memory_space<vmem>>, %arg6: memref<16x1xf32, #tpu.memory_space<vmem>>, %arg7: memref<1x1xf32, #tpu.memory_space<vmem>>, %arg8: memref<1x128xf32, #tpu.memory_space<vmem>>) attributes {dimension_semantics = [#tpu.dimension_semantics<parallel>], iteration_bounds = array<i64: 1>, scalar_prefetch = 0 : i64, scratch_operands = 0 : i64, tpu.core_type = #tpu.core_type<tc>, window_params = [{transform_indices = @transform_0, window_bounds = array<i64: 128, 32>}, {pipeline_mode = #tpu.pipeline_mode<synchronous>, transform_indices = @transform_1, window_bounds = array<i64: 32, 32>}, {pipeline_mode = #tpu.pipeline_mode<synchronous>, transform_indices = @transform_2, window_bounds = array<i64: 32, 1>}, {pipeline_mode = #tpu.pipeline_mode<synchronous>, transform_indices = @transform_3, window_bounds = array<i64: 16, 32>}, {pipeline_mode = #tpu.pipeline_mode<synchronous>, transform_indices = @transform_4, window_bounds = array<i64: 16, 1>}, {pipeline_mode = #tpu.pipeline_mode<synchronous>, transform_indices = @transform_5, window_bounds = array<i64: 16, 1>}, {pipeline_mode = #tpu.pipeline_mode<synchronous>, transform_indices = @transform_6, window_bounds = array<i64: 1, 1>}, {transform_indices = @transform_7, window_bounds = array<i64: 1, 128>}]} {
    %c0 = arith.constant 0 : index
    %c0_0 = arith.constant 0 : index
    %0 = vector.load %arg1[%c0, %c0_0] : memref<128x32xf32, #tpu.memory_space<vmem>>, vector<128x32xf32>
    %c0_1 = arith.constant 0 : index
    %c0_2 = arith.constant 0 : index
    %1 = vector.load %arg2[%c0_1, %c0_2] : memref<32x32xf32, #tpu.memory_space<vmem>>, vector<32x32xf32>
    %cst = arith.constant dense<0.000000e+00> : vector<32x128xf32>
    %2 = tpu.matmul %1, %0, %cst {dimension_numbers = #tpu.dot_dimension_numbers<[1], [1], [0], [0], [0, 0, 1, 0], [], []>} : vector<32x32xf32>, vector<128x32xf32>, vector<32x128xf32> -> vector<32x128xf32>
    %c0_3 = arith.constant 0 : index
    %c0_4 = arith.constant 0 : index
    %3 = vector.load %arg3[%c0_3, %c0_4] : memref<32x1xf32, #tpu.memory_space<vmem>>, vector<32x1xf32>
    %4 = vector.broadcast %3 : vector<32x1xf32> to vector<32x128xf32>
    %5 = arith.addf %2, %4 : vector<32x128xf32>
    %cst_5 = arith.constant 0.000000e+00 : f32
    %6 = vector.broadcast %cst_5 : f32 to vector<32x128xf32>
    %7 = arith.maximumf %5, %6 : vector<32x128xf32>
    %c0_6 = arith.constant 0 : index
    %c0_7 = arith.constant 0 : index
    %8 = vector.load %arg4[%c0_6, %c0_7] : memref<16x32xf32, #tpu.memory_space<vmem>>, vector<16x32xf32>
    %cst_8 = arith.constant dense<0.000000e+00> : vector<16x128xf32>
    %9 = tpu.matmul %8, %7, %cst_8 {dimension_numbers = #tpu.dot_dimension_numbers<[1], [0], [0], [1], [0, 0, 1, 1], [], []>} : vector<16x32xf32>, vector<32x128xf32>, vector<16x128xf32> -> vector<16x128xf32>
    %c0_9 = arith.constant 0 : index
    %c0_10 = arith.constant 0 : index
    %10 = vector.load %arg5[%c0_9, %c0_10] : memref<16x1xf32, #tpu.memory_space<vmem>>, vector<16x1xf32>
    %11 = vector.broadcast %10 : vector<16x1xf32> to vector<16x128xf32>
    %12 = arith.addf %9, %11 : vector<16x128xf32>
    %cst_11 = arith.constant 0.000000e+00 : f32
    %13 = vector.broadcast %cst_11 : f32 to vector<16x128xf32>
    %14 = arith.maximumf %12, %13 : vector<16x128xf32>
    %c0_12 = arith.constant 0 : index
    %c0_13 = arith.constant 0 : index
    %15 = vector.load %arg6[%c0_12, %c0_13] : memref<16x1xf32, #tpu.memory_space<vmem>>, vector<16x1xf32>
    %16 = vector.broadcast %15 : vector<16x1xf32> to vector<16x128xf32>
    %17 = arith.mulf %14, %16 : vector<16x128xf32>
    %cst_14 = arith.constant dense<0.000000e+00> : vector<128xf32>
    %18 = vector.multi_reduction <add>, %17, %cst_14 [0] : vector<16x128xf32> to vector<128xf32>
    %19 = vector.shape_cast %18 : vector<128xf32> to vector<1x128xf32>
    %c0_15 = arith.constant 0 : index
    %c0_16 = arith.constant 0 : index
    %20 = vector.load %arg7[%c0_15, %c0_16] : memref<1x1xf32, #tpu.memory_space<vmem>>, vector<1x1xf32>
    %21 = vector.broadcast %20 : vector<1x1xf32> to vector<1x128xf32>
    %22 = arith.addf %19, %21 : vector<1x128xf32>
    %c0_17 = arith.constant 0 : index
    %c0_18 = arith.constant 0 : index
    %23 = vector.load %arg8[%c0_17, %c0_18] : memref<1x128xf32, #tpu.memory_space<vmem>>, vector<1x128xf32>
    tpu.vector_store %arg8[%c0_17, %c0_18], %22 {strides = array<i32>} : memref<1x128xf32, #tpu.memory_space<vmem>>, vector<1x128xf32>,
    return
  }
  func.func @transform_0(%arg0: i32) -> (i32, i32) {
    %c0_i32 = arith.constant 0 : i32
    %c0_i32_0 = arith.constant 0 : i32
    return %arg0, %c0_i32 : i32, i32
  }
  func.func @transform_1(%arg0: i32) -> (i32, i32) {
    %c0_i32 = arith.constant 0 : i32
    %c0_i32_0 = arith.constant 0 : i32
    %c0_i32_1 = arith.constant 0 : i32
    return %c0_i32, %c0_i32_0 : i32, i32
  }
  func.func @transform_2(%arg0: i32) -> (i32, i32) {
    %c0_i32 = arith.constant 0 : i32
    %c0_i32_0 = arith.constant 0 : i32
    %c0_i32_1 = arith.constant 0 : i32
    return %c0_i32, %c0_i32_0 : i32, i32
  }
  func.func @transform_3(%arg0: i32) -> (i32, i32) {
    %c0_i32 = arith.constant 0 : i32
    %c0_i32_0 = arith.constant 0 : i32
    %c0_i32_1 = arith.constant 0 : i32
    return %c0_i32, %c0_i32_0 : i32, i32
  }
  func.func @transform_4(%arg0: i32) -> (i32, i32) {
    %c0_i32 = arith.constant 0 : i32
    %c0_i32_0 = arith.constant 0 : i32
    %c0_i32_1 = arith.constant 0 : i32
    return %c0_i32, %c0_i32_0 : i32, i32
  }
  func.func @transform_5(%arg0: i32) -> (i32, i32) {
    %c0_i32 = arith.constant 0 : i32
    %c0_i32_0 = arith.constant 0 : i32
    %c0_i32_1 = arith.constant 0 : i32
    return %c0_i32, %c0_i32_0 : i32, i32
  }
  func.func @transform_6(%arg0: i32) -> (i32, i32) {
    %c0_i32 = arith.constant 0 : i32
    %c0_i32_0 = arith.constant 0 : i32
    %c0_i32_1 = arith.constant 0 : i32
    return %c0_i32, %c0_i32_0 : i32, i32
  }
  func.func @transform_7(%arg0: i32) -> (i32, i32) {
    %c0_i32 = arith.constant 0 : i32
    %c0_i32_0 = arith.constant 0 : i32
    return %c0_i32, %arg0 : i32, i32
  }
}

</mosaic_0001>

<bundles_post_ra>
// kernel: tpu_custom_call.1
= control target key start
LH: loop header
LB: loop body
LE: loop exit
PB: predicated region body
PF: predicated region fallthrough
CT: control target
= control target key end

     0   :  { %s535_s0 = inlined_call_operand.vmem [shape: f32[128,32], index: 0, kind: input, shape index: {}]   ;;  %s536_s1 = inlined_call_operand.vmem [shape: f32[32,32], index: 1, kind: input, shape index: {}]   ;;  %s537_s2 = inlined_call_operand.vmem [shape: f32[32,1], index: 2, kind: input, shape index: {}]   ;;  %s538_s3 = inlined_call_operand.vmem [shape: f32[16,32], index: 3, kind: input, shape index: {}]   ;;  %s539_s4 = inlined_call_operand.vmem [shape: f32[16,1], index: 4, kind: input, shape index: {}]   ;;  %s540_s5 = inlined_call_operand.vmem [shape: f32[16,1], index: 5, kind: input, shape index: {}]   ;;  %s541_s6 = inlined_call_operand.<no memory space> [shape: f32[1,1], index: 6, kind: input, shape index: {}]   ;;  %s542_s7 = inlined_call_operand.hbm [shape: f32[1,128], index: 7, kind: output, shape index: {}]  }
   0x1   :  { %v12_v0 = vstv %s541_s6 }
   0x2   :  { %13 = vst [vmem:[#allocation2] sm:$0x1] %v12_v0 }
   0x3   :  { %v44_v1 = vld [vmem:[%s535_s0 + $0x78] sm:$0xff]  ;;  %vm73_vm0 = vcmask 261120   ;;  %v43_v2 = vld [vmem:[%s535_s0 + $0x70] sm:$0xff] }
   0x4   :  { %281 = vmatpush.xpose.msk.msra.mxu3 %vm73_vm0, %v44_v1  ;;  %280 = vmatpush.xpose.msk.msra.mxu2 %vm73_vm0, %v44_v1 }
   0x5   :  { %258 = vmatpush.xpose.msk.msra.mxu0 %vm73_vm0, %v44_v1 }
   0x6   :  { %14 = vsyncpa [#allocation4], 0  ;;  %v42_v3 = vld [vmem:[%s535_s0 + $0x68] sm:$0xff]  ;;  %v41_v4 = vld [vmem:[%s535_s0 + $0x60] sm:$0xff]  ;;  %v343_v13 = vmov 0   ;;  %s249_s12 = sshll.u32 %s542_s7, 4  ;;  %s250_s12 = int_to_ptr.hbm [resolvable:$true] %s249_s12 }
   0x7   :  { %v40_v5 = vld [vmem:[%s535_s0 + $0x58] sm:$0xff]  ;;  %v39_v6 = vld [vmem:[%s535_s0 + $0x50] sm:$0xff]  ;;  %v38_v7 = vld [vmem:[%s535_s0 + $0x48] sm:$0xff]  ;;  %314 = vset.pattern.permute.xlu0 %v343_v13  ;;  %315 = vset.pattern.permute.xlu1 %v343_v13 }
   0x8   :  { %283 = vmatpush.xpose.msk.msra.mxu3 %vm73_vm0, %v43_v2  ;;  %282 = vmatpush.xpose.msk.msra.mxu2 %vm73_vm0, %v43_v2  ;;  %v37_v8 = vld [vmem:[%s535_s0 + $0x40] sm:$0xff]  ;;  %v36_v9 = vld [vmem:[%s535_s0 + $0x38] sm:$0xff]  ;;  %v50_v11 = vld [vmem:[%s537_s2 + $0x8] sm:$0xff] }
   0x9   :  { %259 = vmatpush.xpose.msk.msra.mxu0 %vm73_vm0, %v43_v2  ;;  %v52_v10 = vld [vmem:[%s537_s2 + $0x18] sm:$0xff]  ;;  %v35_v12 = vld [vmem:[%s535_s0 + $0x30] sm:$0xff]  ;;  %60 = vperm.xlu1 %315, %v50_v11   ;;  %v34_v14 = vld [vmem:[%s535_s0 + $0x28] sm:$0xff] }
   0xa   :  { %70 = vperm.xlu0 %314, %v52_v10   ;;  %316 = vset.pattern.permute.xlu2 %v343_v13  ;;  %v51_v15 = vld [vmem:[%s537_s2 + $0x10] sm:$0xff]  ;;  %v49_v16 = vld [vmem:[%s537_s2] sm:$0xff]  ;;  %v32_v18 = vld [vmem:[%s535_s0 + $0x18] sm:$0xff] }
   0xb   :  { %v33_v17 = vld [vmem:[%s535_s0 + $0x20] sm:$0xff]  ;;  %v213_v20 = vld [vmem:[%s540_s5 + $0x8] sm:$0xff]  ;;  %v31_v21 = vld [vmem:[%s535_s0 + $0x10] sm:$0xff] }
   0xc   :  { %285 = vmatpush.xpose.msk.msra.mxu3 %vm73_vm0, %v42_v3  ;;  %284 = vmatpush.xpose.msk.msra.mxu2 %vm73_vm0, %v42_v3  ;;  %v212_v19 = vld [vmem:[%s540_s5] sm:$0xff]  ;;  %v30_v22 = vld [vmem:[%s535_s0 + $0x8] sm:$0xff]  ;;  %v47_v24 = vld [vmem:[%s536_s1 + $0x10] sm:$0xff] }
   0xd   :  { %260 = vmatpush.xpose.msk.msra.mxu0 %vm73_vm0, %v42_v3  ;;  %v29_v23 = vld [vmem:[%s535_s0] sm:$0xff]  ;;  %v46_v25 = vld [vmem:[%s536_s1 + $0x8] sm:$0xff]  ;;  %v48_v27 = vld [vmem:[%s536_s1 + $0x18] sm:$0xff] }
   0xe   :  { %v45_v26 = vld [vmem:[%s536_s1] sm:$0xff]  ;;  %v170_v32 = vld [vmem:[%s539_s4 + $0x8] sm:$0xff] }
   0xf   :  { %v169_v28 = vld [vmem:[%s539_s4] sm:$0xff]  ;;  %v168_v48 = vld [vmem:[%s538_s3 + $0x8] sm:$0xff] }
  0x10   :  { %287 = vmatpush.xpose.msk.msra.mxu3 %vm73_vm0, %v41_v4  ;;  %286 = vmatpush.xpose.msk.msra.mxu2 %vm73_vm0, %v41_v4  ;;  %v233_v39 = vld [vmem:[#allocation2] sm:$0x1] }
  0x11   :  { %261 = vmatpush.xpose.msk.msra.mxu0 %vm73_vm0, %v41_v4  ;;  %55 = vperm.xlu1 %315, %v49_v16   ;;  %v167_v47 = vld [vmem:[%s538_s3] sm:$0xff]  ;;  %s344_s3 = smov [#allocation3]  }
  0x12   :  { %65 = vperm.xlu0 %314, %v51_v15   ;;  %173 = vperm.xlu2 %316, %v169_v28   ;;  %s247_s9 = sshll.u32 %s344_s3, 4  ;;  %s248_s9 = int_to_ptr.vmem [resolvable:$true] %s247_s9 }
  0x14   :  { %289 = vmatpush.xpose.msk.msra.mxu3 %vm73_vm0, %v40_v5  ;;  %288 = vmatpush.xpose.msk.msra.mxu2 %vm73_vm0, %v40_v5 }
  0x15   :  { %262 = vmatpush.xpose.msk.msra.mxu0 %vm73_vm0, %v40_v5 }
  0x18   :  { %291 = vmatpush.xpose.msk.msra.mxu3 %vm73_vm0, %v39_v6  ;;  %290 = vmatpush.xpose.msk.msra.mxu2 %vm73_vm0, %v39_v6 }
  0x19   :  { %263 = vmatpush.xpose.msk.msra.mxu0 %vm73_vm0, %v39_v6  ;;  %221 = vperm.xlu1 %315, %v213_v20  }
  0x1a   :  { %216 = vperm.xlu0 %314, %v212_v19   ;;  %178 = vperm.xlu2 %316, %v170_v32  }
  0x1c   :  { %293 = vmatpush.xpose.msk.msra.mxu3 %vm73_vm0, %v38_v7  ;;  %292 = vmatpush.xpose.msk.msra.mxu2 %vm73_vm0, %v38_v7 }
  0x1d   :  { %264 = vmatpush.xpose.msk.msra.mxu0 %vm73_vm0, %v38_v7 }
  0x20   :  { %295 = vmatpush.xpose.msk.msra.mxu3 %vm73_vm0, %v37_v8  ;;  %294 = vmatpush.xpose.msk.msra.mxu2 %vm73_vm0, %v37_v8 }
  0x21   :  { %265 = vmatpush.xpose.msk.msra.mxu0 %vm73_vm0, %v37_v8 }
  0x22   :  { %236 = vperm.xlu2 %316, %v233_v39  }
  0x24   :  { %297 = vmatpush.xpose.msk.msra.mxu3 %vm73_vm0, %v36_v9  ;;  %296 = vmatpush.xpose.msk.msra.mxu2 %vm73_vm0, %v36_v9 }
  0x25   :  { %266 = vmatpush.xpose.msk.msra.mxu0 %vm73_vm0, %v36_v9 }
  0x28   :  { %299 = vmatpush.xpose.msk.msra.mxu3 %vm73_vm0, %v35_v12  ;;  %298 = vmatpush.xpose.msk.msra.mxu2 %vm73_vm0, %v35_v12 }
  0x29   :  { %267 = vmatpush.xpose.msk.msra.mxu0 %vm73_vm0, %v35_v12 }
  0x2c   :  { %301 = vmatpush.xpose.msk.msra.mxu3 %vm73_vm0, %v34_v14  ;;  %300 = vmatpush.xpose.msk.msra.mxu2 %vm73_vm0, %v34_v14 }
  0x2d   :  { %268 = vmatpush.xpose.msk.msra.mxu0 %vm73_vm0, %v34_v14 }
  0x30   :  { %303 = vmatpush.xpose.msk.msra.mxu3 %vm73_vm0, %v33_v17  ;;  %302 = vmatpush.xpose.msk.msra.mxu2 %vm73_vm0, %v33_v17 }
  0x31   :  { %269 = vmatpush.xpose.msk.msra.mxu0 %vm73_vm0, %v33_v17 }
  0x34   :  { %305 = vmatpush.xpose.msk.msra.mxu3 %vm73_vm0, %v32_v18  ;;  %304 = vmatpush.xpose.msk.msra.mxu2 %vm73_vm0, %v32_v18 }
  0x35   :  { %270 = vmatpush.xpose.msk.msra.mxu0 %vm73_vm0, %v32_v18 }
  0x38   :  { %307 = vmatpush.xpose.msk.msra.mxu3 %vm73_vm0, %v31_v21  ;;  %306 = vmatpush.xpose.msk.msra.mxu2 %vm73_vm0, %v31_v21 }
  0x39   :  { %271 = vmatpush.xpose.msk.msra.mxu0 %vm73_vm0, %v31_v21 }
  0x3c   :  { %309 = vmatpush.xpose.msk.msra.mxu3 %vm73_vm0, %v30_v22  ;;  %308 = vmatpush.xpose.msk.msra.mxu2 %vm73_vm0, %v30_v22 }
  0x3d   :  { %272 = vmatpush.xpose.msk.msra.mxu0 %vm73_vm0, %v30_v22 }
  0x40   :  { %311 = vmatpush.xpose.msk.msra.mxu3 %vm73_vm0, %v29_v23  ;;  %310 = vmatpush.xpose.msk.msra.mxu2 %vm73_vm0, %v29_v23 }
  0x41   :  { %273 = vmatpush.xpose.msk.msra.mxu0 %vm73_vm0, %v29_v23 }
  0x43   :  { %276 = vmatmul.msk.f32.vlgmr.msra.gmra.mxu3 %vm73_vm0, %v47_v24  ;;  %275 = vmatmul.msk.f32.vlgmr.msra.gmra.mxu2 %vm73_vm0, %v46_v25 }
  0x44   :  { %274 = vmatmul.msk.f32.vlgmr.msra.gmra.mxu0 %vm73_vm0, %v45_v26 }
  0x4b   :  { %277 = vmatmul.msk.f32.gmra.mxu3 %vm73_vm0, %v48_v27 }
  0x6c   :  { %v174_v49 = vpop.permute.xlu2 %173 }
  0x74   :  { %v179_v52 = vpop.permute.xlu2 %178 }
  0x7b   :  { %v61_v31 = vpop.permute.xlu1 %60 }
  0x7c   :  { %v71_v29 = vpop.permute.xlu0 %70  ;;  %v237_v2 = vpop.permute.xlu2 %236 }
  0x7d   :  { %v239_v4 = vperm.slane %v237_v2, 0 }
  0x83   :  { %v56_v42 = vpop.permute.xlu1 %55 }
  0x84   :  { %v66_v33 = vpop.permute.xlu0 %65 }
  0x8b   :  { %v222_v58 = vpop.permute.xlu1 %221 }
  0x8c   :  { %v217_v57 = vpop.permute.xlu0 %216 }
  0xc1   :  { %v151_v38 = vpop.f32.mrf.mxu0 }
  0xc2   :  { %v152_v44 = vadd.f32 %v151_v38, %v56_v42 }
  0xc4   :  { %v163_v46 = vmax.f32 %v152_v44, 0.0 }
  0xc6   :  { %v157_v30 = vpop.f32.mrf.mxu3  ;;  %v154_v34 = vpop.f32.mrf.mxu2 }
  0xc7   :  { %v158_v36 = vadd.f32 %v157_v30, %v66_v33  ;;  %v155_v40 = vadd.f32 %v154_v34, %v61_v31 }
  0xc9   :  { %v165_v43 = vmax.f32 %v158_v36, 0.0  ;;  %v164_v45 = vmax.f32 %v155_v40, 0.0 }
  0xce   :  { %v160_v35 = vpop.f32.mrf.mxu3 }
  0xcf   :  { %v161_v37 = vadd.f32 %v160_v35, %v71_v29 }
  0xd1   :  { %v166_v41 = vmax.f32 %v161_v37, 0.0 }
  0xd3   :  { %199 = vmatpush.msra.mxu1 %v166_v41 }
  0xd5   :  { %200 = vmatpush.msra.mxu1 %v165_v43 }
  0xd7   :  { %201 = vmatpush.msra.mxu1 %v164_v45 }
  0xd9   :  { %202 = vmatpush.msra.mxu1 %v163_v46 }
  0xda   :  { %278 = vmatmul.msk.f32.vlgmr.msra.gmra.mxu1 %vm73_vm0, %v167_v47 }
  0xe2   :  { %279 = vmatmul.msk.f32.gmra.mxu1 %vm73_vm0, %v168_v48 }
 0x157   :  { %v204_v50 = vpop.f32.mrf.mxu1 }
 0x158   :  { %v205_v51 = vadd.f32 %v204_v50, %v174_v49 }
 0x15a   :  { %v210_v54 = vmax.f32 %v205_v51, 0.0 }
 0x15c   :  { %v224_v59 = vmul.f32 %v217_v57, %v210_v54 }
 0x15f   :  { %v207_v53 = vpop.f32.mrf.mxu1 }
 0x160   :  { %v208_v55 = vadd.f32 %v207_v53, %v179_v52 }
 0x162   :  { %v211_v56 = vmax.f32 %v208_v55, 0.0 }
 0x164   :  { %v225_v60 = vmul.f32 %v222_v58, %v211_v56 }
 0x166   :  { %v226_v61 = vadd.f32 %v225_v60, %v224_v59 }
 0x168   :  { %v227_v62 = vrot.slane %v226_v61, 4 }
 0x16a   :  { %v228_v63 = vadd.f32 %v227_v62, %v226_v61 }
 0x16c   :  { %v229_v0 = vrot.slane %v228_v63, 2 }
 0x16e   :  { %v230_v1 = vadd.f32 %v229_v0, %v228_v63 }
 0x170   :  { %v231_v3 = vrot.slane %v230_v1, 1 }
 0x172   :  { %v232_v5 = vadd.f32 %v231_v3, %v230_v1 }
 0x174   :  { %v240_v6 = vadd.f32 %v239_v4, %v232_v5 }
 0x176   :  { %241 = vst [vmem:[#allocation3] sm:$0x1] %v240_v6 }
 0x177   :  { %252 = dma.vmem_to_hbm [thread:$0]  %s248_s9, 16, %s250_s12, [#allocation4]  }
 0x178   :  { %341 = dma.done.wait [#allocation4], 16  }
 0x179   :  { %342 = vsyncadd [#allocation4], 4294967280 }
 0x17a   :  { %257 = vsyncpa [#allocation4], 1 }

</bundles_post_ra>
